<compile_context>
chip_gen: v7x
topology: tpu7x:2x2x1
jax: 0.10.0
libtpu: 0.0.40
codegen_flags: <defaults>
</compile_context>

<pallas_src>
import functools

import numpy as np
import jax
import jax.numpy as jnp
from jax.experimental import pallas as pl
from jax.experimental.pallas import tpu as pltpu


# Sign pattern of the 2x2 Haar analysis filters (matches the PyTorch weights):
# band 0: a+b+c+d, band 1: a-b+c-d, band 2: a+b-c-d, band 3: a-b-c+d.
_SIGNS = np.array([[1,  1,  1,  1],
                   [1, -1,  1, -1],
                   [1,  1, -1, -1],
                   [1, -1, -1,  1]], dtype=np.float32)


@functools.lru_cache(maxsize=None)
def _haar_mix_matrix(W, r, dtype_name):
    """Constant (2rW, 2rW) matrix G such that, for a kernel row z packing r
    row-pairs [even|odd]*r, (z @ G) holds sub-band k in the contiguous lane
    slab [k*r*w, (k+1)*r*w).  The 1/4 normalization is folded in."""
    w = W // 2
    K = 2 * r * W                                   # == 4*r*w
    G = np.zeros((K, K), dtype=np.float32)
    g = np.arange(r)[:, None]                       # row-pair group in the row
    j = np.arange(w)[None, :]                       # output column
    rows_a = (2 * g * W + 2 * j).ravel()            # x[c, 2i,   2j  ]
    rows_b = rows_a + 1                             # x[c, 2i,   2j+1]
    rows_c = rows_a + W                             # x[c, 2i+1, 2j  ]
    rows_d = rows_a + W + 1                         # x[c, 2i+1, 2j+1]
    for k in range(4):
        cols = (k * r * w + g * w + j).ravel()      # band-major lane slabs
        G[rows_a, cols] = 0.25 * _SIGNS[k, 0]
        G[rows_b, cols] = 0.25 * _SIGNS[k, 1]
        G[rows_c, cols] = 0.25 * _SIGNS[k, 2]
        G[rows_d, cols] = 0.25 * _SIGNS[k, 3]
    return jnp.asarray(G, dtype=jnp.dtype(dtype_name))


def _haar_kernel(x_ref, g_ref, o_ref):
    # x_ref: (1, rows_blk, 4*r*w)   packed row-pair groups [even|odd] * r
    # g_ref: (4*r*w, 4*r*w)         constant Haar mixing matrix (1/4 folded in)
    # o_ref: (1, 4, rows_blk, r*w)  band-major, lane-dense output slabs
    y = jnp.dot(x_ref[0], g_ref[...], preferred_element_type=jnp.float32)
    band = o_ref.shape[3]
    for k in range(4):                # static unroll; slabs are lane-aligned
        o_ref[0, k] = y[:, k * band:(k + 1) * band].astype(o_ref.dtype)


def _pick_r(C, h, w, max_band=512):
    """Row-pair packing factor: smallest divisor of C*h making the per-band
    output slab r*w lane-dense (>=128, preferably a multiple of 128)."""
    if w >= 128:
        return 1
    total = C * h
    cap = min(total, max(1, max_band // w))         # cap mixing-matrix size
    divisors = [d for d in range(1, cap + 1) if total % d == 0]
    aligned = [d for d in divisors if (d * w) % 128 == 0]
    if aligned:
        return min(aligned)
    dense = [d for d in divisors if d * w >= 128]
    if dense:
        return min(dense)
    return max(divisors)                            # tiny input: best effort


def _pick_rows_block(R, bytes_per_row, B, *, budget_bytes=2 << 20,
                     min_grid_steps=16):
    """Rows per grid step: divisor of R, sublane-friendly (%8 or full), fits the
    per-step budget, and keeps enough grid steps for megacore + pipelining."""
    candidates = [d for d in range(1, R + 1)
                  if R % d == 0 and (d % 8 == 0 or d == R)]
    fitting = [d for d in candidates if d * bytes_per_row <= budget_bytes]
    if not fitting:
        # TODO(synk): for gigantic rows, additionally split the lane dimension.
        return min(candidates)
    want_blocks = max(1, -(-min_grid_steps // max(B, 1)))
    good = [d for d in fitting if (R // d) >= want_blocks]
    return max(good) if good else max(fitting)


def haar_downsampling_forward(x, logdet):
    """Equivalent of HaarDownsampling(channel_in=C).forward(x, logdet, reverse=False)."""
    B, C, H, W = x.shape
    assert H % 2 == 0 and W % 2 == 0
    h, w = H // 2, W // 2
    itemsize = jnp.dtype(x.dtype).itemsize

    r = _pick_r(C, h, w)
    band = r * w                      # per-band lane slab width
    K = 4 * band                      # == 2*r*W, matmul K/N dim
    R = (C * h) // r                  # kernel rows per batch
    rows_blk = _pick_rows_block(R, 8 * band * itemsize, B)
    num_blocks = R // rows_blk

    x2 = x.reshape(B, R, K)           # free contiguous reshape
    g = _haar_mix_matrix(W, r, jnp.dtype(x.dtype).name)

    out4 = pl.pallas_call(
        _haar_kernel,
        out_shape=jax.ShapeDtypeStruct((B, 4, R, band), x.dtype),
        grid=(B, num_blocks),
        in_specs=[
            pl.BlockSpec((1, rows_blk, K), lambda b, q: (b, q, 0)),
            pl.BlockSpec((K, K), lambda b, q: (0, 0)),
        ],
        out_specs=pl.BlockSpec((1, 4, rows_blk, band), lambda b, q: (b, 0, q, 0)),
        compiler_params=pltpu.CompilerParams(
            dimension_semantics=("parallel", "parallel"),
            vmem_limit_bytes=32 * 1024 * 1024),
        cost_estimate=pl.CostEstimate(
            flops=2 * B * R * K * K,
            bytes_accessed=2 * B * C * H * W * itemsize + K * K * itemsize,
            transcendentals=0),
    )(x2, g)

    # Free contiguous reshape; final channel index = k*C + c, matching
    # PyTorch's reshape -> transpose(1,2) -> reshape.
    out = out4.reshape(B, 4 * C, h, w)

    # Log-determinant update exactly as in the PyTorch module (reverse=False).
    elements = C * H * W
    last_jac = elements / 4 * np.log(16.0)
    logdet = jnp.asarray(logdet)
    return out, logdet + jnp.asarray(last_jac, dtype=logdet.dtype)


def _reference_forward(x, logdet):
    """Pure-JAX reference mirroring the PyTorch grouped conv + reshuffle."""
    B, C, H, W = x.shape
    xr = x.reshape(B, C, H // 2, 2, W // 2, 2)
    a = xr[:, :, :, 0, :, 0]
    b = xr[:, :, :, 0, :, 1]
    c = xr[:, :, :, 1, :, 0]
    d = xr[:, :, :, 1, :, 1]
    out = jnp.stack(
        [a + b + c + d, a - b + c - d, a + b - c - d, a - b - c + d],
        axis=1) * 0.25                             # (B, 4, C, h, w)
    out = out.reshape(B, 4 * C, H // 2, W // 2)
    last_jac = C * H * W / 4 * np.log(16.0)
    logdet = jnp.asarray(logdet)
    return out, logdet + jnp.asarray(last_jac, dtype=logdet.dtype)


if __name__ == "__main__":
    key = jax.random.PRNGKey(0)
    B, C, H, W = 2, 4, 16, 16
    x = jax.random.normal(key, (B, C, H, W), dtype=jnp.float32)
    logdet = jnp.float32(0.0)

    out, ld = haar_downsampling_forward(x, logdet)
    jax.block_until_ready(out)
    jax.block_until_ready(ld)

    ref_out, ref_ld = _reference_forward(x, logdet)
    np.testing.assert_allclose(np.asarray(out), np.asarray(ref_out),
                               rtol=1e-5, atol=1e-5)
    np.testing.assert_allclose(float(ld), float(ref_ld), rtol=1e-6)
    assert out.shape == (B, 4 * C, H // 2, W // 2)
    assert out.dtype == x.dtype

    print("KERNEL_OK")
</pallas_src>

<mosaic_0001>
module attributes {stable_mosaic.version = 11 : i64} {
  func.func @_haar_kernel(%arg0: i32, %arg1: i32, %arg2: memref<1x2x512xf32, #tpu.memory_space<vmem>>, %arg3: memref<512x512xf32, #tpu.memory_space<vmem>>, %arg4: memref<1x4x2x128xf32, #tpu.memory_space<vmem>>) attributes {dimension_semantics = [#tpu.dimension_semantics<parallel>, #tpu.dimension_semantics<parallel>], iteration_bounds = array<i64: 2, 1>, scalar_prefetch = 0 : i64, scratch_operands = 0 : i64, tpu.core_type = #tpu.core_type<tc>, window_params = [{transform_indices = @transform_0, window_bounds = array<i64: 1, 2, 512>}, {pipeline_mode = #tpu.pipeline_mode<synchronous>, transform_indices = @transform_1, window_bounds = array<i64: 512, 512>}, {transform_indices = @transform_2, window_bounds = array<i64: 1, 4, 2, 128>}]} {
    %c0 = arith.constant 0 : index
    %c0_0 = arith.constant 0 : index
    %c0_1 = arith.constant 0 : index
    %0 = vector.load %arg2[%c0, %c0_0, %c0_1] : memref<1x2x512xf32, #tpu.memory_space<vmem>>, vector<1x2x512xf32>
    %1 = vector.shape_cast %0 : vector<1x2x512xf32> to vector<2x512xf32>
    %c0_2 = arith.constant 0 : index
    %c0_3 = arith.constant 0 : index
    %2 = vector.load %arg3[%c0_2, %c0_3] : memref<512x512xf32, #tpu.memory_space<vmem>>, vector<512x512xf32>
    %cst = arith.constant dense<0.000000e+00> : vector<2x512xf32>
    %3 = tpu.matmul %1, %2, %cst {dimension_numbers = #tpu.dot_dimension_numbers<[1], [0], [0], [1], [0, 0, 1, 1], [], []>} : vector<2x512xf32>, vector<512x512xf32>, vector<2x512xf32> -> vector<2x512xf32>
    %4 = vector.extract_strided_slice %3 {offsets = [0, 0], sizes = [2, 128], strides = [1, 1]} : vector<2x512xf32> to vector<2x128xf32>
    %c0_4 = arith.constant 0 : index
    %c0_5 = arith.constant 0 : index
    %c0_6 = arith.constant 0 : index
    %c0_7 = arith.constant 0 : index
    %5 = vector.load %arg4[%c0_4, %c0_5, %c0_6, %c0_7] : memref<1x4x2x128xf32, #tpu.memory_space<vmem>>, vector<1x1x2x128xf32>
    %6 = vector.shape_cast %5 : vector<1x1x2x128xf32> to vector<2x128xf32>
    %7 = vector.shape_cast %4 : vector<2x128xf32> to vector<1x1x2x128xf32>
    tpu.vector_store %arg4[%c0_4, %c0_5, %c0_6, %c0_7], %7 {strides = array<i32>} : memref<1x4x2x128xf32, #tpu.memory_space<vmem>>, vector<1x1x2x128xf32>,
    %8 = vector.extract_strided_slice %3 {offsets = [0, 128], sizes = [2, 128], strides = [1, 1]} : vector<2x512xf32> to vector<2x128xf32>
    %c0_8 = arith.constant 0 : index
    %c1 = arith.constant 1 : index
    %c0_9 = arith.constant 0 : index
    %c0_10 = arith.constant 0 : index
    %9 = vector.load %arg4[%c0_8, %c1, %c0_9, %c0_10] : memref<1x4x2x128xf32, #tpu.memory_space<vmem>>, vector<1x1x2x128xf32>
    %10 = vector.shape_cast %9 : vector<1x1x2x128xf32> to vector<2x128xf32>
    %11 = vector.shape_cast %8 : vector<2x128xf32> to vector<1x1x2x128xf32>
    tpu.vector_store %arg4[%c0_8, %c1, %c0_9, %c0_10], %11 {strides = array<i32>} : memref<1x4x2x128xf32, #tpu.memory_space<vmem>>, vector<1x1x2x128xf32>,
    %12 = vector.extract_strided_slice %3 {offsets = [0, 256], sizes = [2, 128], strides = [1, 1]} : vector<2x512xf32> to vector<2x128xf32>
    %c0_11 = arith.constant 0 : index
    %c2 = arith.constant 2 : index
    %c0_12 = arith.constant 0 : index
    %c0_13 = arith.constant 0 : index
    %13 = vector.load %arg4[%c0_11, %c2, %c0_12, %c0_13] : memref<1x4x2x128xf32, #tpu.memory_space<vmem>>, vector<1x1x2x128xf32>
    %14 = vector.shape_cast %13 : vector<1x1x2x128xf32> to vector<2x128xf32>
    %15 = vector.shape_cast %12 : vector<2x128xf32> to vector<1x1x2x128xf32>
    tpu.vector_store %arg4[%c0_11, %c2, %c0_12, %c0_13], %15 {strides = array<i32>} : memref<1x4x2x128xf32, #tpu.memory_space<vmem>>, vector<1x1x2x128xf32>,
    %16 = vector.extract_strided_slice %3 {offsets = [0, 384], sizes = [2, 128], strides = [1, 1]} : vector<2x512xf32> to vector<2x128xf32>
    %c0_14 = arith.constant 0 : index
    %c3 = arith.constant 3 : index
    %c0_15 = arith.constant 0 : index
    %c0_16 = arith.constant 0 : index
    %17 = vector.load %arg4[%c0_14, %c3, %c0_15, %c0_16] : memref<1x4x2x128xf32, #tpu.memory_space<vmem>>, vector<1x1x2x128xf32>
    %18 = vector.shape_cast %17 : vector<1x1x2x128xf32> to vector<2x128xf32>
    %19 = vector.shape_cast %16 : vector<2x128xf32> to vector<1x1x2x128xf32>
    tpu.vector_store %arg4[%c0_14, %c3, %c0_15, %c0_16], %19 {strides = array<i32>} : memref<1x4x2x128xf32, #tpu.memory_space<vmem>>, vector<1x1x2x128xf32>,
    return
  }
  func.func @transform_0(%arg0: i32, %arg1: i32) -> (i32, i32, i32) {
    %c0_i32 = arith.constant 0 : i32
    %c0_i32_0 = arith.constant 0 : i32
    return %arg0, %arg1, %c0_i32 : i32, i32, i32
  }
  func.func @transform_1(%arg0: i32, %arg1: i32) -> (i32, i32) {
    %c0_i32 = arith.constant 0 : i32
    %c0_i32_0 = arith.constant 0 : i32
    %c0_i32_1 = arith.constant 0 : i32
    return %c0_i32, %c0_i32_0 : i32, i32
  }
  func.func @transform_2(%arg0: i32, %arg1: i32) -> (i32, i32, i32, i32) {
    %c0_i32 = arith.constant 0 : i32
    %c0_i32_0 = arith.constant 0 : i32
    %c0_i32_1 = arith.constant 0 : i32
    return %arg0, %c0_i32, %arg1, %c0_i32_0 : i32, i32, i32, i32
  }
}

</mosaic_0001>

<bundles_post_ra>
// kernel: tpu_custom_call.1
= control target key start
LH: loop header
LB: loop body
LE: loop exit
PB: predicated region body
PF: predicated region fallthrough
CT: control target
= control target key end

     0   :  { %7 = vsyncpa [#allocation3], 0  ;;  %s1648_s0 = inlined_call_operand.hbm [shape: f32[2,2,512], index: 0, kind: input, shape index: {}]   ;;  %s1649_s1 = inlined_call_operand.hbm [shape: f32[512,512], index: 1, kind: input, shape index: {}]   ;;  %s1650_s2 = inlined_call_operand.hbm [shape: f32[2,4,2,128], index: 2, kind: output, shape index: {}]  }
   0x1   :  { %9 = vsyncpa [#allocation3 + $0x1], 0 }
   0x2   :  { %10 = vsyncpa [#allocation6], 0 }
   0x3   :  { %11 = vsyncpa [#allocation4], 0 }
   0x4   :  { %13 = vsyncpa [#allocation4 + $0x1], 0  ;;  %s1404_s9 = smov 0   ;;  %s1406_s10 = smov 0  }
   0x5   :  { %s1408_s11 = smov 0   ;;  %s1410_s12 = smov 0  }
   0x6   :  { %s1412_s13 = smov 0   ;;  %s1414_s14 = smov 0  }
   0x7 LB: > { %s874_s15 = sadd.s32 4294967295, %s1379_s14   ;;  %s875_s16 = sadd.s32 4294967294, %s1379_s14   ;;  %s1379_s14 = sphi %s1414_s14, %s19_s14   ;;  %s1375_s13 = sphi %s1412_s13, %s1674_s13   ;;  %s1371_s12 = sphi %s1410_s12, %s1673_s12   ;;  %s1367_s11 = sphi %s1408_s11, %s1672_s11   ;;  %s1363_s10 = sphi %s1406_s10, %s1671_s10   ;;  %s1359_s9 = sphi %s1404_s9, %s1670_s9  }
   0x8   : > { %p53_p0 = scmp.ne.s32.totalorder %s1363_s10, %s1359_s9  ;;  %p1438_p1 = scmp.eq.s32.totalorder %s874_s15, 0 }
   0x9   : > { %p1442_p2 = scmp.eq.s32.totalorder %s874_s15, 1  ;;  %p106_p3 = scmp.eq.s32.totalorder %s875_s16, 1 }
   0xa   : > { %s1655_s17 = scalar_select %p1438_p1, 1, 0 }
   0xb   : > { %s1656_s18 = scalar_select %p1442_p2, 1, 0 }
   0xc   : > { %p1448_p4 = por %p1438_p1, %p53_p0  ;;  %p876_p5 = scmp.ge.s32.totalorder %s1379_s14, 1 }
   0xd   : > { %p1453_p6 = por %p106_p3, %p53_p0  ;;  %p113_p7 = scmp.lt.s32.totalorder %s1379_s14, 3 }
   0xe   : > { %s1657_s19 = scalar_select %p1448_p4, 1, 0 }
   0xf   : > { %s1658_s20 = scalar_select %p1453_p6, 1, 0 }
  0x10   : > { %p1458_p8 = pnand %p876_p5, %p113_p7  ;;  %s1381_s22 = smov [#allocation5]  }
  0x11   : > { %s125_s23 = sshll.u32 %s1381_s22, 4  ;;  %s31_s25 = sadd.s32 1, %s1375_s13  ;;  %s126_s23 = int_to_ptr.vmem [resolvable:$true] %s125_s23 }
  0x12   : > { %s1659_s21 = scalar_select %p1458_p8, 1, 0 }
  0x13   : > { %p1164_p9 = pneg %p1458_p8  ;;  %s1235_s28 = scalar_lea.hbm %s1649_s1, 32768 }
  0x14   : > { %p1236_p12 = scmp.ne.s32.totalorder %s1649_s1, %s1235_s28  ;;  %p1242_p5 = scmp.lt.u32.totalorder %s1235_s28, %s1649_s1 }
  0x15   : > { %p1467_p11 = pnand %p1164_p9, %p1438_p1 }
  0x17   : > { %p1237_p13 = pneg %p1467_p11 }
  0x19   : > { %p1238_p0 = pnand %p1237_p13, %p1236_p12 }
  0x1b   : > { %p1239_p3 = pneg %p1238_p0 }
  0x1d   : > { %p1244_p7 = pnand %p1242_p5, %p1239_p3 }
  0x1f   : > { %1247 = shalt.err (!%p1244_p7)
}
  0x20   : > { %s1248_s5 = scalar_lea.vmem %s126_s23, 32768  ;;  %p1256_p1 = scmp.lt.s32.totalorder %s126_s23, %s126_s23 }
  0x21   : > { %p1249_p9 = scmp.ne.s32.totalorder %s126_s23, %s1248_s5  ;;  %p1257_p4 = scmp.lt.s32.totalorder %s1248_s5, %s1248_s5 }
  0x23   : > { %p1251_p10 = pnand %p1249_p9, %p1237_p13  ;;  %p1258_p8 = por %p1257_p4, %p1256_p1 }
  0x25   : > { %p1252_p6 = pneg %p1251_p10 }
  0x27   : > { %p1259_p2 = pnand %p1258_p8, %p1252_p6 }
  0x29   : > { %1262 = shalt.err (!%p1259_p2)
}
  0x2a   : > { %s1382_s6 = smov 512   ;;  %s1383_s7 = smov 32  }
  0x2b   : > { %1167 = dma.hbm_to_vmem [thread:$0]  (!%p1467_p11), %s1649_s1, 32768, %s126_s23, [#allocation6], %s1382_s6, %s1382_s6, %s1383_s7  }
  0x2c   : > { %p33_p1 = scmp.ge.s32.totalorder %s31_s25, 2  ;;  %s40_s16 = sadd.s32 1, %s1367_s11 }
  0x2d   : > { %p47_p2 = scmp.ne.s32.totalorder %s1367_s11, %s1363_s10  ;;  %p48_p4 = scmp.eq.s32.totalorder %s1379_s14, 0 }
  0x2e   : > { %s1676_s25 = smov (%p33_p1, %s31_s25), 0  ;;  %p1662_p8 = scmp.ne.s32.totalorder %s1656_s18, 0 }
  0x2f   : > { %p1494_p6 = por %p48_p4, %p47_p2  ;;  %s35_s24 = ssub.s32 %s1375_s13, %s1676_s25 }
  0x30   : > { %p1500_p10 = por %p1662_p8, %p47_p2  ;;  %p1177_p12 = scmp.lt.s32.totalorder %s1379_s14, 2 }
  0x31   : > { %p38_p11 = scmp.eq.s32.totalorder %s35_s24, 0  ;;  %s139_s23 = sand.u32 1, %s1367_s11  }
  0x32   : > { %s879_s27 = sshll.u32 %s139_s23, 3  ;;  %s894_s29 = sshll.u32 %s1375_s13, 7 }
  0x33   : > { %s1509_s28 = scalar_select %p38_p11, %s1367_s11, %s40_s16  }
  0x34   : > { %s1515_s4 = scalar_lea.hbm %s1648_s0, %s894_s29  ;;  %s143_s18 = scalar_lea.vmem [#allocation2], %s879_s27 }
  0x35   : > { %s153_s5 = sshll.u32 %s143_s18, 4  ;;  %p1521_p13 = pnand %p1177_p12, %p1494_p6  ;;  %s1517_s5 = int_to_ptr.vmem [resolvable:$true] %s153_s5 }
  0x36   : > { %s140_s7 = scalar_lea.sflag [#allocation3], %s139_s23  ;;  %s1263_s8 = scalar_lea.hbm %s1515_s4, 128 }
  0x37   : > { %p1264_p0 = scmp.ne.s32.totalorder %s1515_s4, %s1263_s8  ;;  %p1265_p3 = pneg %p1521_p13 }
  0x38   : > { %s1268_s24 = scalar_lea.hbm %s1648_s0, 256  ;;  %p1269_p9 = scmp.lt.u32.totalorder %s1515_s4, %s1648_s0 }
  0x39   : > { %p1266_p5 = pnand %p1265_p3, %p1264_p0  ;;  %p1270_p1 = scmp.lt.u32.totalorder %s1268_s24, %s1263_s8 }
  0x3a   : > { %p1272_p4 = scmp.lt.u32.totalorder %s1263_s8, %s1515_s4 }
  0x3b   : > { %p1267_p7 = pneg %p1266_p5  ;;  %p1271_p2 = por %p1270_p1, %p1269_p9 }
  0x3d   : > { %p1273_p6 = por %p1272_p4, %p1271_p2 }
  0x3f   : > { %p1274_p8 = pnand %p1273_p6, %p1267_p7 }
  0x41   : > { %1277 = shalt.err (!%p1274_p8)
}
  0x42   : > { %s1278_s23 = scalar_lea.vmem %s1517_s5, 128  ;;  %s1384_s29 = smov [#allocation2]  }
  0x43   : > { %p1279_p12 = scmp.ne.s32.totalorder %s1517_s5, %s1278_s23  ;;  %s1283_s30 = sshll.u32 %s1384_s29, 4  ;;  %s1284_s30 = int_to_ptr.vmem [resolvable:$false] %s1283_s30 }
  0x44   : > { %s1285_s3 = scalar_lea.vmem %s1284_s30, 256  ;;  %p1286_p5 = scmp.lt.s32.totalorder %s1517_s5, %s1284_s30 }
  0x45   : > { %p1281_p11 = pnand %p1279_p12, %p1265_p3  ;;  %p1287_p9 = scmp.lt.s32.totalorder %s1285_s3, %s1278_s23 }
  0x47   : > { %p1282_p0 = pneg %p1281_p11  ;;  %p1288_p1 = por %p1287_p9, %p1286_p5 }
  0x49   : > { %p1289_p2 = pnand %p1288_p1, %p1282_p0 }
  0x4b   : > { %1292 = shalt.err (!%p1289_p2)
}
  0x4c   : > { %1171 = dma.hbm_to_vmem [thread:$0]  (!%p1521_p13), %s1515_s4, 128, %s1517_s5, %s140_s7  }
  0x4d   : > { %p1665_p7 = scmp.ne.s32.totalorder %s1659_s21, 0 }
  0x4e   : > { %s1553_s18 = sand.u32 (!%p1665_p7), 1, %s1363_s10   ;;  %p1666_p3 = scmp.ne.s32.totalorder (!%p1665_p7), %s1657_s19, 0 }
  0x4f   : > { %162 = sbr.rel (%p1665_p7) target bundleno = 451 (0x1c3), region = 28  ;;  %s883_s8 = sshll.u32 (!%p1665_p7), %s1553_s18, 3 }
  0x50   : > { %s165_s15 = scalar_lea.sflag (!%p1665_p7), [#allocation3], %s1553_s18  ;;  %s1559_s16 = scalar_lea.vmem (!%p1665_p7), [#allocation2], %s883_s8 }
  0x56   : > { %1346 = dma.done.wait (%p1666_p3), %s165_s15, 128  }
  0x57   : > { %1348 = vsyncadd (%p1666_p3), %s165_s15, 4294967168  ;;  %p1667_p13 = scmp.ne.s32.totalorder %s1655_s17, 0 }
  0x59   : > { %1350 = dma.done.wait (%p1667_p13), [#allocation6], 32768  }
  0x5a   : > { %1352 = vsyncadd (%p1667_p13), [#allocation6], 4294934528  ;;  %v195_v0 = vld [vmem:[#allocation5 + $0x8] sm:$0xff]  ;;  %v197_v2 = vld [vmem:[#allocation5 + $0x18] sm:$0xff]  ;;  %s192_s17 = scalar_lea.vmem [#allocation7], %s883_s8  ;;  %s895_s21 = sshll.u32 %s1371_s12, 7 }
  0x5b   : > { %v199_v1 = vld [vmem:[#allocation5 + $0x28] sm:$0xff]  ;;  %v201_v4 = vld [vmem:[#allocation5 + $0x38] sm:$0xff]  ;;  %v194_v5 = vld [vmem:[#allocation5] sm:$0xff]  ;;  %s778_s19 = sshll.u32 %s192_s17, 4  ;;  %s1599_s6 = scalar_lea.hbm %s1650_s2, %s895_s21  ;;  %s1594_s19 = int_to_ptr.vmem [resolvable:$true] %s778_s19 }
  0x5c   : > { %v896_v3 = vpack.c.bf16 %v199_v1, %v195_v0  ;;  %v198_v6 = vld [vmem:[#allocation5 + $0x20] sm:$0xff]  ;;  %v1024_v7 = vpack.c.bf16 %v201_v4, %v197_v2  ;;  %v196_v9 = vld [vmem:[#allocation5 + $0x10] sm:$0xff]  ;;  %v203_v11 = vld [vmem:[#allocation5 + $0x48] sm:$0xff]  ;;  %s764_s7 = scalar_lea.sflag [#allocation4], %s1553_s18  ;;  %s1293_s12 = scalar_lea.vmem %s1594_s19, 128 }
  0x5d   : > { %v898_v8 = vpack.c.bf16 %v198_v6, %v194_v5  ;;  %v200_v10 = vld [vmem:[#allocation5 + $0x30] sm:$0xff]  ;;  %v207_v13 = vld [vmem:[#allocation5 + $0x68] sm:$0xff]  ;;  %v205_v14 = vld [vmem:[#allocation5 + $0x58] sm:$0xff]  ;;  %p1294_p4 = scmp.ne.s32.totalorder %s1594_s19, %s1293_s12  ;;  %s1386_s24 = smov [#allocation7]  }
  0x5e   : > { %897 = vmatprep.subr.bf16.mxu0 %v896_v3  ;;  %v1026_v12 = vpack.c.bf16 %v200_v10, %v196_v9  ;;  %v209_v15 = vld [vmem:[#allocation5 + $0x78] sm:$0xff]  ;;  %1025 = vmatprep.subr.bf16.mxu1 %v1024_v7  ;;  %v900_v16 = vpack.c.bf16 %v207_v13, %v203_v11  ;;  %v202_v18 = vld [vmem:[#allocation5 + $0x40] sm:$0xff]  ;;  %v204_v20 = vld [vmem:[#allocation5 + $0x50] sm:$0xff]  ;;  %s1297_s22 = sshll.u32 %s1386_s24, 4  ;;  %s1298_s22 = int_to_ptr.vmem [resolvable:$false] %s1297_s22 }
  0x5f   : > { %899 = vmatpush1.bf16.msra.mxu0 %v898_v8  ;;  %v1028_v17 = vpack.c.bf16 %v209_v15, %v205_v14  ;;  %v206_v19 = vld [vmem:[#allocation5 + $0x60] sm:$0xff]  ;;  %v208_v22 = vld [vmem:[#allocation5 + $0x70] sm:$0xff]  ;;  %v211_v23 = vld [vmem:[#allocation5 + $0x88] sm:$0xff]  ;;  %p1295_p6 = pnand %p1294_p4, %p1500_p10  ;;  %s1299_s27 = scalar_lea.vmem %s1298_s22, 256 }
  0x60   : > { %1027 = vmatpush1.bf16.msra.mxu1 %v1026_v12  ;;  %v902_v21 = vpack.c.bf16 %v206_v19, %v202_v18  ;;  %v215_v24 = vld [vmem:[#allocation5 + $0xa8] sm:$0xff]  ;;  %901 = vmatprep.subr.bf16.mxu0 %v900_v16  ;;  %v1030_v25 = vpack.c.bf16 %v208_v22, %v204_v20  ;;  %v213_v27 = vld [vmem:[#allocation5 + $0x98] sm:$0xff]  ;;  %v210_v29 = vld [vmem:[#allocation5 + $0x80] sm:$0xff]  ;;  %p1300_p12 = scmp.lt.s32.totalorder %s1594_s19, %s1298_s22  ;;  %p1301_p11 = scmp.lt.s32.totalorder %s1299_s27, %s1293_s12 }
  0x61   : > { %1029 = vmatprep.subr.bf16.mxu1 %v1028_v17  ;;  %v904_v26 = vpack.c.bf16 %v215_v24, %v211_v23  ;;  %v217_v28 = vld [vmem:[#allocation5 + $0xb8] sm:$0xff]  ;;  %v214_v31 = vld [vmem:[#allocation5 + $0xa0] sm:$0xff]  ;;  %v212_v32 = vld [vmem:[#allocation5 + $0x90] sm:$0xff]  ;;  %p1296_p8 = pneg %p1295_p6 }
  0x62   : > { %v1032_v30 = vpack.c.bf16 %v217_v28, %v213_v27  ;;  %v216_v33 = vld [vmem:[#allocation5 + $0xb0] sm:$0xff]  ;;  %v906_v34 = vpack.c.bf16 %v214_v31, %v210_v29  ;;  %v219_v35 = vld [vmem:[#allocation5 + $0xc8] sm:$0xff]  ;;  %v221_v37 = vld [vmem:[#allocation5 + $0xd8] sm:$0xff]  ;;  %p1302_p0 = por %p1301_p11, %p1300_p12 }
  0x63   : > { %903 = vmatpush1.bf16.msra.mxu0 %v902_v21  ;;  %v223_v36 = vld [vmem:[#allocation5 + $0xe8] sm:$0xff]  ;;  %v1034_v38 = vpack.c.bf16 %v216_v33, %v212_v32  ;;  %v225_v40 = vld [vmem:[#allocation5 + $0xf8] sm:$0xff]  ;;  %v218_v41 = vld [vmem:[#allocation5 + $0xc0] sm:$0xff] }
  0x64   : > { %1031 = vmatpush1.bf16.msra.mxu1 %v1030_v25  ;;  %905 = vmatprep.subr.bf16.mxu0 %v904_v26  ;;  %v908_v39 = vpack.c.bf16 %v223_v36, %v219_v35  ;;  %v222_v42 = vld [vmem:[#allocation5 + $0xe0] sm:$0xff]  ;;  %v1036_v43 = vpack.c.bf16 %v225_v40, %v221_v37  ;;  %v220_v44 = vld [vmem:[#allocation5 + $0xd0] sm:$0xff]  ;;  %v227_v46 = vld [vmem:[#allocation5 + $0x108] sm:$0xff]  ;;  %p1303_p5 = pnand %p1302_p0, %p1296_p8 }
  0x65   : > { %1033 = vmatprep.subr.bf16.mxu1 %v1032_v30  ;;  %v224_v45 = vld [vmem:[#allocation5 + $0xf0] sm:$0xff]  ;;  %v231_v47 = vld [vmem:[#allocation5 + $0x128] sm:$0xff]  ;;  %v229_v48 = vld [vmem:[#allocation5 + $0x118] sm:$0xff]  ;;  %v910_v50 = vpack.c.bf16 %v222_v42, %v218_v41 }
  0x66   : > { %v233_v49 = vld [vmem:[#allocation5 + $0x138] sm:$0xff]  ;;  %v1038_v51 = vpack.c.bf16 %v224_v45, %v220_v44  ;;  %v912_v52 = vpack.c.bf16 %v231_v47, %v227_v46  ;;  %v226_v53 = vld [vmem:[#allocation5 + $0x100] sm:$0xff]  ;;  %v228_v55 = vld [vmem:[#allocation5 + $0x110] sm:$0xff]  ;;  %v1385_v46 = vmov 1983009808  }
  0x67   : > { %907 = vmatpush1.bf16.msra.mxu0 %v906_v34  ;;  %v230_v54 = vld [vmem:[#allocation5 + $0x120] sm:$0xff]  ;;  %v1040_v56 = vpack.c.bf16 %v233_v49, %v229_v48  ;;  %v232_v57 = vld [vmem:[#allocation5 + $0x130] sm:$0xff]  ;;  %v235_v58 = vld [vmem:[#allocation5 + $0x148] sm:$0xff]  ;;  %v453_v47 = vunpack.c.l.s4 %v1385_v46  ;;  %v455_v48 = vlaneseq }
  0x68   : > { %1035 = vmatpush1.bf16.msra.mxu1 %v1034_v38  ;;  %909 = vmatprep.subr.bf16.mxu0 %v908_v39  ;;  %v239_v59 = vld [vmem:[#allocation5 + $0x168] sm:$0xff]  ;;  %v237_v60 = vld [vmem:[#allocation5 + $0x158] sm:$0xff]  ;;  %v914_v62 = vpack.c.bf16 %v230_v54, %v226_v53  ;;  %v1042_v63 = vpack.c.bf16 %v232_v57, %v228_v55  ;;  %v234_v1 = vld [vmem:[#allocation5 + $0x140] sm:$0xff] }
  0x69   : > { %1037 = vmatprep.subr.bf16.mxu1 %v1036_v43  ;;  %v241_v61 = vld [vmem:[#allocation5 + $0x178] sm:$0xff]  ;;  %v916_v0 = vpack.c.bf16 %v239_v59, %v235_v58  ;;  %v238_v2 = vld [vmem:[#allocation5 + $0x160] sm:$0xff]  ;;  %v236_v3 = vld [vmem:[#allocation5 + $0x150] sm:$0xff] }
  0x6a   : > { %v1044_v4 = vpack.c.bf16 %v241_v61, %v237_v60  ;;  %v240_v5 = vld [vmem:[#allocation5 + $0x170] sm:$0xff]  ;;  %v243_v6 = vld [vmem:[#allocation5 + $0x188] sm:$0xff]  ;;  %v245_v8 = vld [vmem:[#allocation5 + $0x198] sm:$0xff]  ;;  %v918_v10 = vpack.c.bf16 %v238_v2, %v234_v1  ;;  %v454_v61 = vunpack.c.0.s8 %v453_v47 }
  0x6b   : > { %911 = vmatpush1.bf16.msra.mxu0 %v910_v50  ;;  %v247_v7 = vld [vmem:[#allocation5 + $0x1a8] sm:$0xff]  ;;  %v249_v9 = vld [vmem:[#allocation5 + $0x1b8] sm:$0xff]  ;;  %v1046_v11 = vpack.c.bf16 %v240_v5, %v236_v3  ;;  %v242_v13 = vld [vmem:[#allocation5 + $0x180] sm:$0xff] }
  0x6c   : > { %1039 = vmatpush1.bf16.msra.mxu1 %v1038_v51  ;;  %913 = vmatprep.subr.bf16.mxu0 %v912_v52  ;;  %v920_v12 = vpack.c.bf16 %v247_v7, %v243_v6  ;;  %v246_v14 = vld [vmem:[#allocation5 + $0x1a0] sm:$0xff]  ;;  %v244_v15 = vld [vmem:[#allocation5 + $0x190] sm:$0xff]  ;;  %v1048_v16 = vpack.c.bf16 %v249_v9, %v245_v8  ;;  %v251_v18 = vld [vmem:[#allocation5 + $0x1c8] sm:$0xff] }
  0x6d   : > { %1041 = vmatprep.subr.bf16.mxu1 %v1040_v56  ;;  %v248_v17 = vld [vmem:[#allocation5 + $0x1b0] sm:$0xff]  ;;  %v255_v19 = vld [vmem:[#allocation5 + $0x1e8] sm:$0xff]  ;;  %v253_v20 = vld [vmem:[#allocation5 + $0x1d8] sm:$0xff]  ;;  %v922_v22 = vpack.c.bf16 %v246_v14, %v242_v13 }
  0x6e   : > { %v257_v21 = vld [vmem:[#allocation5 + $0x1f8] sm:$0xff]  ;;  %v1050_v23 = vpack.c.bf16 %v248_v17, %v244_v15  ;;  %v924_v24 = vpack.c.bf16 %v255_v19, %v251_v18  ;;  %v250_v25 = vld [vmem:[#allocation5 + $0x1c0] sm:$0xff]  ;;  %v252_v27 = vld [vmem:[#allocation5 + $0x1d0] sm:$0xff] }
  0x6f   : > { %915 = vmatpush1.bf16.msra.mxu0 %v914_v62  ;;  %v254_v26 = vld [vmem:[#allocation5 + $0x1e0] sm:$0xff]  ;;  %v1052_v28 = vpack.c.bf16 %v257_v21, %v253_v20  ;;  %v256_v29 = vld [vmem:[#allocation5 + $0x1f0] sm:$0xff]  ;;  %v259_v30 = vld [vmem:[#allocation5 + $0x208] sm:$0xff]  ;;  %v456_v62 = vshrl.u32 %v455_v48, 7 }
  0x70   : > { %1043 = vmatpush1.bf16.msra.mxu1 %v1042_v63  ;;  %917 = vmatprep.subr.bf16.mxu0 %v916_v0  ;;  %v263_v31 = vld [vmem:[#allocation5 + $0x228] sm:$0xff]  ;;  %v261_v32 = vld [vmem:[#allocation5 + $0x218] sm:$0xff]  ;;  %v926_v34 = vpack.c.bf16 %v254_v26, %v250_v25  ;;  %v1054_v35 = vpack.c.bf16 %v256_v29, %v252_v27  ;;  %v258_v37 = vld [vmem:[#allocation5 + $0x200] sm:$0xff] }
  0x71   : > { %1045 = vmatprep.subr.bf16.mxu1 %v1044_v4  ;;  %v265_v33 = vld [vmem:[#allocation5 + $0x238] sm:$0xff]  ;;  %v928_v36 = vpack.c.bf16 %v263_v31, %v259_v30  ;;  %v262_v38 = vld [vmem:[#allocation5 + $0x220] sm:$0xff]  ;;  %v260_v39 = vld [vmem:[#allocation5 + $0x210] sm:$0xff] }
  0x72   : > { %v1056_v40 = vpack.c.bf16 %v265_v33, %v261_v32  ;;  %v264_v41 = vld [vmem:[#allocation5 + $0x230] sm:$0xff]  ;;  %v267_v42 = vld [vmem:[#allocation5 + $0x248] sm:$0xff]  ;;  %v269_v44 = vld [vmem:[#allocation5 + $0x258] sm:$0xff]  ;;  %v930_v49 = vpack.c.bf16 %v262_v38, %v258_v37 }
  0x73   : > { %919 = vmatpush1.bf16.msra.mxu0 %v918_v10  ;;  %v271_v43 = vld [vmem:[#allocation5 + $0x268] sm:$0xff]  ;;  %v273_v45 = vld [vmem:[#allocation5 + $0x278] sm:$0xff]  ;;  %v1058_v50 = vpack.c.bf16 %v264_v41, %v260_v39  ;;  %v266_v52 = vld [vmem:[#allocation5 + $0x240] sm:$0xff] }
  0x74   : > { %1047 = vmatpush1.bf16.msra.mxu1 %v1046_v11  ;;  %921 = vmatprep.subr.bf16.mxu0 %v920_v12  ;;  %v932_v51 = vpack.c.bf16 %v271_v43, %v267_v42  ;;  %v270_v53 = vld [vmem:[#allocation5 + $0x260] sm:$0xff]  ;;  %v268_v54 = vld [vmem:[#allocation5 + $0x250] sm:$0xff]  ;;  %v1060_v55 = vpack.c.bf16 %v273_v45, %v269_v44  ;;  %v275_v57 = vld [vmem:[#allocation5 + $0x288] sm:$0xff]  ;;  %v1569_v11 = vsub.s32 %v454_v61, %v456_v62 }
  0x75   : > { %1049 = vmatprep.subr.bf16.mxu1 %v1048_v16  ;;  %v272_v56 = vld [vmem:[#allocation5 + $0x270] sm:$0xff]  ;;  %v279_v58 = vld [vmem:[#allocation5 + $0x2a8] sm:$0xff]  ;;  %v277_v59 = vld [vmem:[#allocation5 + $0x298] sm:$0xff]  ;;  %v934_v63 = vpack.c.bf16 %v270_v53, %v266_v52 }
  0x76   : > { %v281_v60 = vld [vmem:[#allocation5 + $0x2b8] sm:$0xff]  ;;  %v1062_v0 = vpack.c.bf16 %v272_v56, %v268_v54  ;;  %v936_v1 = vpack.c.bf16 %v279_v58, %v275_v57  ;;  %v274_v2 = vld [vmem:[#allocation5 + $0x280] sm:$0xff]  ;;  %v276_v4 = vld [vmem:[#allocation5 + $0x290] sm:$0xff] }
  0x77   : > { %923 = vmatpush1.bf16.msra.mxu0 %v922_v22  ;;  %v278_v3 = vld [vmem:[#allocation5 + $0x2a0] sm:$0xff]  ;;  %v1064_v5 = vpack.c.bf16 %v281_v60, %v277_v59  ;;  %v280_v6 = vld [vmem:[#allocation5 + $0x2b0] sm:$0xff]  ;;  %v283_v7 = vld [vmem:[#allocation5 + $0x2c8] sm:$0xff] }
  0x78   : > { %1051 = vmatpush1.bf16.msra.mxu1 %v1050_v23  ;;  %925 = vmatprep.subr.bf16.mxu0 %v924_v24  ;;  %v287_v8 = vld [vmem:[#allocation5 + $0x2e8] sm:$0xff]  ;;  %v285_v9 = vld [vmem:[#allocation5 + $0x2d8] sm:$0xff]  ;;  %v938_v12 = vpack.c.bf16 %v278_v3, %v274_v2  ;;  %v282_v13 = vld [vmem:[#allocation5 + $0x2c0] sm:$0xff]  ;;  %v1066_v14 = vpack.c.bf16 %v280_v6, %v276_v4 }
  0x79   : > { %1053 = vmatprep.subr.bf16.mxu1 %v1052_v28  ;;  %v289_v10 = vld [vmem:[#allocation5 + $0x2f8] sm:$0xff]  ;;  %v940_v15 = vpack.c.bf16 %v287_v8, %v283_v7  ;;  %v286_v16 = vld [vmem:[#allocation5 + $0x2e0] sm:$0xff]  ;;  %v284_v17 = vld [vmem:[#allocation5 + $0x2d0] sm:$0xff] }
  0x7a   : > { %v288_v18 = vld [vmem:[#allocation5 + $0x2f0] sm:$0xff]  ;;  %v1068_v19 = vpack.c.bf16 %v289_v10, %v285_v9  ;;  %v291_v20 = vld [vmem:[#allocation5 + $0x308] sm:$0xff]  ;;  %v293_v23 = vld [vmem:[#allocation5 + $0x318] sm:$0xff]  ;;  %v942_v26 = vpack.c.bf16 %v286_v16, %v282_v13 }
  0x7b   : > { %927 = vmatpush1.bf16.msra.mxu0 %v926_v34  ;;  %v295_v21 = vld [vmem:[#allocation5 + $0x328] sm:$0xff]  ;;  %v1572_v22 = vld [vmem:[%s1559_s16] sm:$0xff]  ;;  %v1070_v27 = vpack.c.bf16 %v288_v18, %v284_v17  ;;  %v290_v29 = vld [vmem:[#allocation5 + $0x300] sm:$0xff] }
  0x7c   : > { %1055 = vmatpush1.bf16.msra.mxu1 %v1054_v35  ;;  %929 = vmatprep.subr.bf16.mxu0 %v928_v36  ;;  %v297_v24 = vld [vmem:[#allocation5 + $0x338] sm:$0xff]  ;;  %v1576_v25 = vrot.slane %v1572_v22, %v1569_v11  ;;  %v944_v28 = vpack.c.bf16 %v295_v21, %v291_v20  ;;  %v294_v30 = vld [vmem:[#allocation5 + $0x320] sm:$0xff]  ;;  %v292_v31 = vld [vmem:[#allocation5 + $0x310] sm:$0xff]  ;;  %v451_v7 = vcombine.high %v1572_v22, %v1572_v22 }
  0x7d   : > { %1057 = vmatprep.subr.bf16.mxu1 %v1056_v40  ;;  %v1072_v33 = vpack.c.bf16 %v297_v24, %v293_v23  ;;  %v296_v34 = vld [vmem:[#allocation5 + $0x330] sm:$0xff]  ;;  %v299_v35 = vld [vmem:[#allocation5 + $0x348] sm:$0xff]  ;;  %v301_v37 = vld [vmem:[#allocation5 + $0x358] sm:$0xff]  ;;  %v946_v39 = vpack.c.bf16 %v294_v30, %v290_v29 }
  0x7e   : > { %v466_v32 = vcombine.high %v1576_v25, %v1576_v25  ;;  %v303_v36 = vld [vmem:[#allocation5 + $0x368] sm:$0xff]  ;;  %v305_v38 = vld [vmem:[#allocation5 + $0x378] sm:$0xff]  ;;  %v1074_v40 = vpack.c.bf16 %v296_v34, %v292_v31  ;;  %v298_v42 = vld [vmem:[#allocation5 + $0x340] sm:$0xff]  ;;  %v1583_v22 = vrot.slane %v451_v7, %v1569_v11 }
  0x7f   : > { %931 = vmatpush1.bf16.msra.mxu0 %v930_v49  ;;  %v948_v41 = vpack.c.bf16 %v303_v36, %v299_v35  ;;  %v302_v43 = vld [vmem:[#allocation5 + $0x360] sm:$0xff]  ;;  %v300_v44 = vld [vmem:[#allocation5 + $0x350] sm:$0xff]  ;;  %v1076_v45 = vpack.c.bf16 %v305_v38, %v301_v37  ;;  %v307_v47 = vld [vmem:[#allocation5 + $0x388] sm:$0xff] }
  0x80   : > { %1059 = vmatpush1.bf16.msra.mxu1 %v1058_v50  ;;  %933 = vmatprep.subr.bf16.mxu0 %v932_v51  ;;  %v304_v46 = vld [vmem:[#allocation5 + $0x370] sm:$0xff]  ;;  %v311_v48 = vld [vmem:[#allocation5 + $0x3a8] sm:$0xff]  ;;  %v309_v49 = vld [vmem:[#allocation5 + $0x398] sm:$0xff]  ;;  %v950_v51 = vpack.c.bf16 %v302_v43, %v298_v42  ;;  %v467_v11 = vcombine.high %v1583_v22, %v1583_v22 }
  0x81   : > { %1061 = vmatprep.subr.bf16.mxu1 %v1060_v55  ;;  %536 = vmatprep.mubr.f32.mxu0 %v466_v32  ;;  %v313_v50 = vld [vmem:[#allocation5 + $0x3b8] sm:$0xff]  ;;  %v1078_v52 = vpack.c.bf16 %v304_v46, %v300_v44  ;;  %v952_v53 = vpack.c.bf16 %v311_v48, %v307_v47  ;;  %v306_v54 = vld [vmem:[#allocation5 + $0x380] sm:$0xff]  ;;  %v308_v56 = vld [vmem:[#allocation5 + $0x390] sm:$0xff] }
  0x82   : > { %678 = vmatprep.mubr.f32.mxu1 %v466_v32  ;;  %v310_v55 = vld [vmem:[#allocation5 + $0x3a0] sm:$0xff]  ;;  %v1080_v57 = vpack.c.bf16 %v313_v50, %v309_v49  ;;  %v312_v58 = vld [vmem:[#allocation5 + $0x3b0] sm:$0xff]  ;;  %v315_v59 = vld [vmem:[#allocation5 + $0x3c8] sm:$0xff] }
  0x83   : > { %935 = vmatpush1.bf16.msra.mxu0 %v934_v63  ;;  %v319_v60 = vld [vmem:[#allocation5 + $0x3e8] sm:$0xff]  ;;  %v317_v61 = vld [vmem:[#allocation5 + $0x3d8] sm:$0xff]  ;;  %v954_v63 = vpack.c.bf16 %v310_v55, %v306_v54  ;;  %v314_v2 = vld [vmem:[#allocation5 + $0x3c0] sm:$0xff] }
  0x84   : > { %1063 = vmatpush1.bf16.msra.mxu1 %v1062_v0  ;;  %937 = vmatprep.subr.bf16.mxu0 %v936_v1  ;;  %v321_v62 = vld [vmem:[#allocation5 + $0x3f8] sm:$0xff]  ;;  %v1082_v0 = vpack.c.bf16 %v312_v58, %v308_v56  ;;  %v956_v1 = vpack.c.bf16 %v319_v60, %v315_v59  ;;  %v318_v3 = vld [vmem:[#allocation5 + $0x3e0] sm:$0xff]  ;;  %v316_v4 = vld [vmem:[#allocation5 + $0x3d0] sm:$0xff] }
  0x85   : > { %1065 = vmatprep.subr.bf16.mxu1 %v1064_v5  ;;  %v1084_v5 = vpack.c.bf16 %v321_v62, %v317_v61  ;;  %v320_v6 = vld [vmem:[#allocation5 + $0x3f0] sm:$0xff]  ;;  %v323_v8 = vld [vmem:[#allocation5 + $0x408] sm:$0xff]  ;;  %v325_v10 = vld [vmem:[#allocation5 + $0x418] sm:$0xff]  ;;  %v958_v13 = vpack.c.bf16 %v318_v3, %v314_v2 }
  0x86   : > { %v327_v9 = vld [vmem:[#allocation5 + $0x428] sm:$0xff]  ;;  %v322_v16 = vld [vmem:[#allocation5 + $0x400] sm:$0xff]  ;;  %v324_v18 = vld [vmem:[#allocation5 + $0x410] sm:$0xff] }
  0x87   : > { %939 = vmatpush1.bf16.msra.mxu0 %v938_v12  ;;  %v329_v12 = vld [vmem:[#allocation5 + $0x438] sm:$0xff]  ;;  %v326_v17 = vld [vmem:[#allocation5 + $0x420] sm:$0xff]  ;;  %v328_v20 = vld [vmem:[#allocation5 + $0x430] sm:$0xff] }
  0x88   : > { %1067 = vmatpush1.bf16.msra.mxu1 %v1066_v14  ;;  %941 = vmatprep.subr.bf16.mxu0 %v940_v15  ;;  %v1086_v14 = vpack.c.bf16 %v320_v6, %v316_v4  ;;  %v960_v15 = vpack.c.bf16 %v327_v9, %v323_v8  ;;  %v331_v21 = vld [vmem:[#allocation5 + $0x448] sm:$0xff]  ;;  %v333_v24 = vld [vmem:[#allocation5 + $0x458] sm:$0xff]  ;;  %v330_v30 = vld [vmem:[#allocation5 + $0x440] sm:$0xff] }
  0x89   : > { %1069 = vmatprep.subr.bf16.mxu1 %v1068_v19  ;;  %v1088_v19 = vpack.c.bf16 %v329_v12, %v325_v10  ;;  %v335_v23 = vld [vmem:[#allocation5 + $0x468] sm:$0xff]  ;;  %v334_v31 = vld [vmem:[#allocation5 + $0x460] sm:$0xff]  ;;  %v332_v32 = vld [vmem:[#allocation5 + $0x450] sm:$0xff] }
  0x8a   : > { %v964_v29 = vpack.c.bf16 %v335_v23, %v331_v21  ;;  %v336_v34 = vld [vmem:[#allocation5 + $0x470] sm:$0xff]  ;;  %v339_v35 = vld [vmem:[#allocation5 + $0x488] sm:$0xff]  ;;  %v341_v37 = vld [vmem:[#allocation5 + $0x498] sm:$0xff] }
  0x8b   : > { %943 = vmatpush1.bf16.msra.mxu0 %v942_v26  ;;  %v337_v26 = vld [vmem:[#allocation5 + $0x478] sm:$0xff]  ;;  %v343_v36 = vld [vmem:[#allocation5 + $0x4a8] sm:$0xff]  ;;  %v338_v42 = vld [vmem:[#allocation5 + $0x480] sm:$0xff] }
  0x8c   : > { %1071 = vmatpush1.bf16.msra.mxu1 %v1070_v27  ;;  %945 = vmatprep.subr.bf16.mxu0 %v944_v28  ;;  %v962_v27 = vpack.c.bf16 %v326_v17, %v322_v16  ;;  %v1090_v28 = vpack.c.bf16 %v328_v20, %v324_v18  ;;  %v345_v38 = vld [vmem:[#allocation5 + $0x4b8] sm:$0xff]  ;;  %v342_v43 = vld [vmem:[#allocation5 + $0x4a0] sm:$0xff]  ;;  %v340_v44 = vld [vmem:[#allocation5 + $0x490] sm:$0xff] }
  0x8d   : > { %1073 = vmatprep.subr.bf16.mxu1 %v1072_v33  ;;  %v1092_v33 = vpack.c.bf16 %v337_v26, %v333_v24  ;;  %v344_v46 = vld [vmem:[#allocation5 + $0x4b0] sm:$0xff]  ;;  %v347_v47 = vld [vmem:[#allocation5 + $0x4c8] sm:$0xff]  ;;  %v349_v49 = vld [vmem:[#allocation5 + $0x4d8] sm:$0xff] }
  0x8e   : > { %v351_v48 = vld [vmem:[#allocation5 + $0x4e8] sm:$0xff]  ;;  %v353_v50 = vld [vmem:[#allocation5 + $0x4f8] sm:$0xff]  ;;  %v350_v54 = vld [vmem:[#allocation5 + $0x4e0] sm:$0xff] }
  0x8f   : > { %947 = vmatpush1.bf16.msra.mxu0 %v946_v39  ;;  %v966_v39 = vpack.c.bf16 %v334_v31, %v330_v30  ;;  %v348_v55 = vld [vmem:[#allocation5 + $0x4d0] sm:$0xff]  ;;  %v1100_v56 = vpack.c.bf16 %v353_v50, %v349_v49  ;;  %v355_v58 = vld [vmem:[#allocation5 + $0x508] sm:$0xff]  ;;  %v357_v60 = vld [vmem:[#allocation5 + $0x518] sm:$0xff] }
  0x90   : > { %1075 = vmatpush1.bf16.msra.mxu1 %v1074_v40  ;;  %949 = vmatprep.subr.bf16.mxu0 %v948_v41  ;;  %v1094_v40 = vpack.c.bf16 %v336_v34, %v332_v32  ;;  %v968_v41 = vpack.c.bf16 %v343_v36, %v339_v35  ;;  %v359_v59 = vld [vmem:[#allocation5 + $0x528] sm:$0xff]  ;;  %v361_v61 = vld [vmem:[#allocation5 + $0x538] sm:$0xff]  ;;  %v358_v2 = vld [vmem:[#allocation5 + $0x520] sm:$0xff] }
  0x91   : > { %1077 = vmatprep.subr.bf16.mxu1 %v1076_v45  ;;  %v1096_v45 = vpack.c.bf16 %v345_v38, %v341_v37  ;;  %v356_v3 = vld [vmem:[#allocation5 + $0x510] sm:$0xff]  ;;  %v1104_v4 = vpack.c.bf16 %v361_v61, %v357_v60  ;;  %v363_v6 = vld [vmem:[#allocation5 + $0x548] sm:$0xff]  ;;  %v365_v8 = vld [vmem:[#allocation5 + $0x558] sm:$0xff] }
  0x92   : > { %v367_v7 = vld [vmem:[#allocation5 + $0x568] sm:$0xff]  ;;  %v369_v9 = vld [vmem:[#allocation5 + $0x578] sm:$0xff]  ;;  %v364_v16 = vld [vmem:[#allocation5 + $0x550] sm:$0xff] }
  0x93   : > { %951 = vmatpush1.bf16.msra.mxu0 %v950_v51  ;;  %v970_v51 = vpack.c.bf16 %v342_v43, %v338_v42  ;;  %v1108_v17 = vpack.c.bf16 %v369_v9, %v365_v8  ;;  %v368_v18 = vld [vmem:[#allocation5 + $0x570] sm:$0xff]  ;;  %v375_v20 = vld [vmem:[#allocation5 + $0x5a8] sm:$0xff]  ;;  %v373_v21 = vld [vmem:[#allocation5 + $0x598] sm:$0xff] }
  0x94   : > { %1079 = vmatpush1.bf16.msra.mxu1 %v1078_v52  ;;  %953 = vmatprep.subr.bf16.mxu0 %v952_v53  ;;  %v972_v52 = vpack.c.bf16 %v351_v48, %v347_v47  ;;  %v346_v53 = vld [vmem:[#allocation5 + $0x4c0] sm:$0xff]  ;;  %v377_v23 = vld [vmem:[#allocation5 + $0x5b8] sm:$0xff]  ;;  %v1110_v26 = vpack.c.bf16 %v368_v18, %v364_v16  ;;  %v372_v30 = vld [vmem:[#allocation5 + $0x590] sm:$0xff] }
  0x95   : > { %1081 = vmatprep.subr.bf16.mxu1 %v1080_v57  ;;  %v352_v57 = vld [vmem:[#allocation5 + $0x4f0] sm:$0xff]  ;;  %v974_v62 = vpack.c.bf16 %v350_v54, %v346_v53  ;;  %v1112_v31 = vpack.c.bf16 %v377_v23, %v373_v21  ;;  %v383_v34 = vld [vmem:[#allocation5 + $0x5e8] sm:$0xff]  ;;  %v381_v35 = vld [vmem:[#allocation5 + $0x5d8] sm:$0xff] }
  0x96   : > { %v376_v32 = vld [vmem:[#allocation5 + $0x5b0] sm:$0xff]  ;;  %v385_v36 = vld [vmem:[#allocation5 + $0x5f8] sm:$0xff]  ;;  %v411_v16 = vld [vmem:[#allocation5 + $0x6c8] sm:$0xff] }
  0x97   : > { %955 = vmatpush1.bf16.msra.mxu0 %v954_v63  ;;  %v1102_v63 = vpack.c.bf16 %v352_v57, %v348_v55  ;;  %v1114_v37 = vpack.c.bf16 %v376_v32, %v372_v30  ;;  %v1116_v42 = vpack.c.bf16 %v385_v36, %v381_v35  ;;  %v384_v43 = vld [vmem:[#allocation5 + $0x5f0] sm:$0xff]  ;;  %v393_v47 = vld [vmem:[#allocation5 + $0x638] sm:$0xff]  ;;  %v395_v55 = vld [vmem:[#allocation5 + $0x648] sm:$0xff] }
  0x98   : > { %1083 = vmatpush1.bf16.msra.mxu1 %v1082_v0  ;;  %957 = vmatprep.subr.bf16.mxu0 %v956_v1  ;;  %v976_v0 = vpack.c.bf16 %v359_v59, %v355_v58  ;;  %v354_v1 = vld [vmem:[#allocation5 + $0x500] sm:$0xff]  ;;  %v392_v54 = vld [vmem:[#allocation5 + $0x630] sm:$0xff]  ;;  %v397_v57 = vld [vmem:[#allocation5 + $0x658] sm:$0xff] }
  0x99   : > { %1085 = vmatprep.subr.bf16.mxu1 %v1084_v5  ;;  %v360_v5 = vld [vmem:[#allocation5 + $0x530] sm:$0xff]  ;;  %v978_v10 = vpack.c.bf16 %v358_v2, %v354_v1  ;;  %v401_v58 = vld [vmem:[#allocation5 + $0x678] sm:$0xff]  ;;  %v419_v30 = vld [vmem:[#allocation5 + $0x708] sm:$0xff] }
  0x9a   : > { %v1106_v12 = vpack.c.bf16 %v360_v5, %v356_v3  ;;  %v1124_v1 = vpack.c.bf16 %v401_v58, %v397_v57  ;;  %v400_v2 = vld [vmem:[#allocation5 + $0x670] sm:$0xff]  ;;  %v403_v3 = vld [vmem:[#allocation5 + $0x688] sm:$0xff]  ;;  %v405_v5 = vld [vmem:[#allocation5 + $0x698] sm:$0xff] }
  0x9b   : > { %959 = vmatpush1.bf16.msra.mxu0 %v958_v13  ;;  %v980_v13 = vpack.c.bf16 %v367_v7, %v363_v6  ;;  %v409_v6 = vld [vmem:[#allocation5 + $0x6b8] sm:$0xff] }
  0x9c   : > { %1087 = vmatpush1.bf16.msra.mxu1 %v1086_v14  ;;  %961 = vmatprep.subr.bf16.mxu0 %v960_v15  ;;  %v362_v14 = vld [vmem:[#allocation5 + $0x540] sm:$0xff]  ;;  %v413_v18 = vld [vmem:[#allocation5 + $0x6d8] sm:$0xff] }
  0x9d   : > { %1089 = vmatprep.subr.bf16.mxu1 %v1088_v19  ;;  %v366_v15 = vld [vmem:[#allocation5 + $0x560] sm:$0xff]  ;;  %v371_v19 = vld [vmem:[#allocation5 + $0x588] sm:$0xff]  ;;  %v421_v32 = vld [vmem:[#allocation5 + $0x718] sm:$0xff] }
  0x9e   : > { %537 = vmatmul.mubr.f32.vlgmr.msra.gmra.mrb[0].mxu0 %v1576_v25  ;;  %v982_v24 = vpack.c.bf16 %v366_v15, %v362_v14  ;;  %v1128_v14 = vpack.c.bf16 %v409_v6, %v405_v5  ;;  %v408_v15 = vld [vmem:[#allocation5 + $0x6b0] sm:$0xff] }
  0x9f   : > { %963 = vmatpush1.bf16.msra.mxu0 %v962_v27  ;;  %679 = vmatmul.mubr.f32.vlgmr.msra.gmra.mrb[0].mxu1 %v1576_v25  ;;  %v1098_v25 = vpack.c.bf16 %v344_v46, %v340_v44  ;;  %v984_v27 = vpack.c.bf16 %v375_v20, %v371_v19  ;;  %v387_v44 = vld [vmem:[#allocation5 + $0x608] sm:$0xff]  ;;  %v389_v46 = vld [vmem:[#allocation5 + $0x618] sm:$0xff] }
  0xa0   : > { %1091 = vmatpush1.bf16.msra.mxu1 %v1090_v28  ;;  %965 = vmatprep.subr.bf16.mxu0 %v964_v29  ;;  %v370_v28 = vld [vmem:[#allocation5 + $0x580] sm:$0xff]  ;;  %v1120_v53 = vpack.c.bf16 %v393_v47, %v389_v46  ;;  %v417_v19 = vld [vmem:[#allocation5 + $0x6f8] sm:$0xff] }
  0xa1   : > { %1093 = vmatprep.subr.bf16.mxu1 %v1092_v33  ;;  %607 = vmatprep.mubr.f32.mxu0 %v467_v11  ;;  %v374_v29 = vld [vmem:[#allocation5 + $0x5a0] sm:$0xff]  ;;  %v379_v33 = vld [vmem:[#allocation5 + $0x5c8] sm:$0xff] }
  0xa2   : > { %749 = vmatprep.mubr.f32.mxu1 %v467_v11  ;;  %v986_v11 = vpack.c.bf16 %v374_v29, %v370_v28  ;;  %v988_v38 = vpack.c.bf16 %v383_v34, %v379_v33  ;;  %v1132_v28 = vpack.c.bf16 %v417_v19, %v413_v18  ;;  %v416_v29 = vld [vmem:[#allocation5 + $0x6f0] sm:$0xff]  ;;  %v425_v33 = vld [vmem:[#allocation5 + $0x738] sm:$0xff] }
  0xa3   : > { %967 = vmatpush1.bf16.msra.mxu0 %v966_v39  ;;  %v378_v39 = vld [vmem:[#allocation5 + $0x5c0] sm:$0xff] }
  0xa4   : > { %1095 = vmatpush1.bf16.msra.mxu1 %v1094_v40  ;;  %969 = vmatprep.subr.bf16.mxu0 %v968_v41  ;;  %v382_v40 = vld [vmem:[#allocation5 + $0x5e0] sm:$0xff]  ;;  %v380_v41 = vld [vmem:[#allocation5 + $0x5d0] sm:$0xff] }
  0xa5   : > { %1097 = vmatprep.subr.bf16.mxu1 %v1096_v45  ;;  %v391_v45 = vld [vmem:[#allocation5 + $0x628] sm:$0xff]  ;;  %v990_v48 = vpack.c.bf16 %v382_v40, %v378_v39  ;;  %v1118_v49 = vpack.c.bf16 %v384_v43, %v380_v41  ;;  %v1136_v39 = vpack.c.bf16 %v425_v33, %v421_v32  ;;  %v424_v40 = vld [vmem:[#allocation5 + $0x730] sm:$0xff]  ;;  %v429_v43 = vld [vmem:[#allocation5 + $0x758] sm:$0xff] }
  0xa6   : > { %v992_v50 = vpack.c.bf16 %v391_v45, %v387_v44  ;;  %v427_v41 = vld [vmem:[#allocation5 + $0x748] sm:$0xff]  ;;  %v433_v44 = vld [vmem:[#allocation5 + $0x778] sm:$0xff] }
  0xa7   : > { %971 = vmatpush1.bf16.msra.mxu0 %v970_v51  ;;  %v386_v51 = vld [vmem:[#allocation5 + $0x600] sm:$0xff] }
  0xa8   : > { %1099 = vmatpush1.bf16.msra.mxu1 %v1098_v25  ;;  %973 = vmatprep.subr.bf16.mxu0 %v972_v52  ;;  %v390_v25 = vld [vmem:[#allocation5 + $0x620] sm:$0xff]  ;;  %v388_v52 = vld [vmem:[#allocation5 + $0x610] sm:$0xff] }
  0xa9   : > { %1101 = vmatprep.subr.bf16.mxu1 %v1100_v56  ;;  %v399_v56 = vld [vmem:[#allocation5 + $0x668] sm:$0xff]  ;;  %v994_v59 = vpack.c.bf16 %v390_v25, %v386_v51  ;;  %v1122_v60 = vpack.c.bf16 %v392_v54, %v388_v52  ;;  %v1140_v51 = vpack.c.bf16 %v433_v44, %v429_v43  ;;  %v432_v25 = vld [vmem:[#allocation5 + $0x770] sm:$0xff]  ;;  %v437_v54 = vld [vmem:[#allocation5 + $0x798] sm:$0xff] }
  0xaa   : > { %v996_v61 = vpack.c.bf16 %v399_v56, %v395_v55  ;;  %v435_v52 = vld [vmem:[#allocation5 + $0x788] sm:$0xff]  ;;  %v441_v55 = vld [vmem:[#allocation5 + $0x7b8] sm:$0xff] }
  0xab   : > { %975 = vmatpush1.bf16.msra.mxu0 %v974_v62  ;;  %v394_v62 = vld [vmem:[#allocation5 + $0x640] sm:$0xff] }
  0xac   : > { %1103 = vmatpush1.bf16.msra.mxu1 %v1102_v63  ;;  %977 = vmatprep.subr.bf16.mxu0 %v976_v0  ;;  %v398_v63 = vld [vmem:[#allocation5 + $0x660] sm:$0xff]  ;;  %v396_v0 = vld [vmem:[#allocation5 + $0x650] sm:$0xff] }
  0xad   : > { %1105 = vmatprep.subr.bf16.mxu1 %v1104_v4  ;;  %v407_v4 = vld [vmem:[#allocation5 + $0x6a8] sm:$0xff]  ;;  %v998_v7 = vpack.c.bf16 %v398_v63, %v394_v62  ;;  %v1126_v8 = vpack.c.bf16 %v400_v2, %v396_v0  ;;  %v1144_v62 = vpack.c.bf16 %v441_v55, %v437_v54  ;;  %v440_v63 = vld [vmem:[#allocation5 + $0x7b0] sm:$0xff]  ;;  %v445_v2 = vld [vmem:[#allocation5 + $0x7d8] sm:$0xff] }
  0xae   : > { %v1000_v9 = vpack.c.bf16 %v407_v4, %v403_v3  ;;  %v443_v0 = vld [vmem:[#allocation5 + $0x7c8] sm:$0xff]  ;;  %v449_v3 = vld [vmem:[#allocation5 + $0x7f8] sm:$0xff] }
  0xaf   : > { %979 = vmatpush1.bf16.msra.mxu0 %v978_v10  ;;  %v402_v10 = vld [vmem:[#allocation5 + $0x680] sm:$0xff] }
  0xb0   : > { %1107 = vmatpush1.bf16.msra.mxu1 %v1106_v12  ;;  %981 = vmatprep.subr.bf16.mxu0 %v980_v13  ;;  %v406_v12 = vld [vmem:[#allocation5 + $0x6a0] sm:$0xff]  ;;  %v404_v13 = vld [vmem:[#allocation5 + $0x690] sm:$0xff] }
  0xb1   : > { %1109 = vmatprep.subr.bf16.mxu1 %v1108_v17  ;;  %v415_v17 = vld [vmem:[#allocation5 + $0x6e8] sm:$0xff]  ;;  %v1002_v20 = vpack.c.bf16 %v406_v12, %v402_v10  ;;  %v1130_v21 = vpack.c.bf16 %v408_v15, %v404_v13  ;;  %v444_v10 = vld [vmem:[#allocation5 + $0x7d0] sm:$0xff] }
  0xb2   : > { %v1004_v23 = vpack.c.bf16 %v415_v17, %v411_v16  ;;  %v448_v12 = vld [vmem:[#allocation5 + $0x7f0] sm:$0xff] }
  0xb3   : > { %983 = vmatpush1.bf16.msra.mxu0 %v982_v24  ;;  %v410_v24 = vld [vmem:[#allocation5 + $0x6c0] sm:$0xff] }
  0xb4   : > { %1111 = vmatpush1.bf16.msra.mxu1 %v1110_v26  ;;  %985 = vmatprep.subr.bf16.mxu0 %v984_v27  ;;  %v414_v26 = vld [vmem:[#allocation5 + $0x6e0] sm:$0xff]  ;;  %v412_v27 = vld [vmem:[#allocation5 + $0x6d0] sm:$0xff] }
  0xb5   : > { %1113 = vmatprep.subr.bf16.mxu1 %v1112_v31  ;;  %v423_v31 = vld [vmem:[#allocation5 + $0x728] sm:$0xff]  ;;  %v1006_v34 = vpack.c.bf16 %v414_v26, %v410_v24  ;;  %v1134_v35 = vpack.c.bf16 %v416_v29, %v412_v27 }
  0xb6   : > { %v1008_v36 = vpack.c.bf16 %v423_v31, %v419_v30 }
  0xb7   : > { %987 = vmatpush1.bf16.msra.mxu0 %v986_v11  ;;  %v418_v11 = vld [vmem:[#allocation5 + $0x700] sm:$0xff] }
  0xb8   : > { %1115 = vmatpush1.bf16.msra.mxu1 %v1114_v37  ;;  %989 = vmatprep.subr.bf16.mxu0 %v988_v38  ;;  %v422_v37 = vld [vmem:[#allocation5 + $0x720] sm:$0xff]  ;;  %v420_v38 = vld [vmem:[#allocation5 + $0x710] sm:$0xff] }
  0xb9   : > { %1117 = vmatprep.subr.bf16.mxu1 %v1116_v42  ;;  %v431_v42 = vld [vmem:[#allocation5 + $0x768] sm:$0xff]  ;;  %v1010_v45 = vpack.c.bf16 %v422_v37, %v418_v11  ;;  %v1138_v46 = vpack.c.bf16 %v424_v40, %v420_v38 }
  0xba   : > { %v1012_v47 = vpack.c.bf16 %v431_v42, %v427_v41 }
  0xbb   : > { %991 = vmatpush1.bf16.msra.mxu0 %v990_v48  ;;  %v426_v48 = vld [vmem:[#allocation5 + $0x740] sm:$0xff] }
  0xbc   : > { %1119 = vmatpush1.bf16.msra.mxu1 %v1118_v49  ;;  %993 = vmatprep.subr.bf16.mxu0 %v992_v50  ;;  %v430_v49 = vld [vmem:[#allocation5 + $0x760] sm:$0xff]  ;;  %v428_v50 = vld [vmem:[#allocation5 + $0x750] sm:$0xff] }
  0xbd   : > { %1121 = vmatprep.subr.bf16.mxu1 %v1120_v53  ;;  %v439_v53 = vld [vmem:[#allocation5 + $0x7a8] sm:$0xff]  ;;  %v1014_v56 = vpack.c.bf16 %v430_v49, %v426_v48  ;;  %v1142_v57 = vpack.c.bf16 %v432_v25, %v428_v50 }
  0xbe   : > { %v1016_v58 = vpack.c.bf16 %v439_v53, %v435_v52 }
  0xbf   : > { %995 = vmatpush1.bf16.msra.mxu0 %v994_v59  ;;  %v434_v59 = vld [vmem:[#allocation5 + $0x780] sm:$0xff] }
  0xc0   : > { %1123 = vmatpush1.bf16.msra.mxu1 %v1122_v60  ;;  %997 = vmatprep.subr.bf16.mxu0 %v996_v61  ;;  %v438_v60 = vld [vmem:[#allocation5 + $0x7a0] sm:$0xff]  ;;  %v436_v61 = vld [vmem:[#allocation5 + $0x790] sm:$0xff] }
  0xc1   : > { %1125 = vmatprep.subr.bf16.mxu1 %v1124_v1  ;;  %v447_v1 = vld [vmem:[#allocation5 + $0x7e8] sm:$0xff]  ;;  %v1018_v4 = vpack.c.bf16 %v438_v60, %v434_v59  ;;  %v1146_v5 = vpack.c.bf16 %v440_v63, %v436_v61 }
  0xc2   : > { %v1020_v6 = vpack.c.bf16 %v447_v1, %v443_v0 }
  0xc3   : > { %999 = vmatpush1.bf16.msra.mxu0 %v998_v7  ;;  %v442_v7 = vld [vmem:[#allocation5 + $0x7c0] sm:$0xff] }
  0xc4   : > { %1127 = vmatpush1.bf16.msra.mxu1 %v1126_v8  ;;  %1001 = vmatprep.subr.bf16.mxu0 %v1000_v9  ;;  %v446_v8 = vld [vmem:[#allocation5 + $0x7e0] sm:$0xff]  ;;  %v1148_v9 = vpack.c.bf16 %v449_v3, %v445_v2 }
  0xc5   : > { %1129 = vmatprep.subr.bf16.mxu1 %v1128_v14  ;;  %v1022_v13 = vpack.c.bf16 %v446_v8, %v442_v7  ;;  %v1150_v14 = vpack.c.bf16 %v448_v12, %v444_v10 }
  0xc7   : > { %1003 = vmatpush1.bf16.msra.mxu0 %v1002_v20 }
  0xc8   : > { %1131 = vmatpush1.bf16.msra.mxu1 %v1130_v21  ;;  %1005 = vmatprep.subr.bf16.mxu0 %v1004_v23 }
  0xc9   : > { %1133 = vmatprep.subr.bf16.mxu1 %v1132_v28 }
  0xcb   : > { %1007 = vmatpush1.bf16.msra.mxu0 %v1006_v34 }
  0xcc   : > { %1135 = vmatpush1.bf16.msra.mxu1 %v1134_v35  ;;  %1009 = vmatprep.subr.bf16.mxu0 %v1008_v36 }
  0xcd   : > { %1137 = vmatprep.subr.bf16.mxu1 %v1136_v39 }
  0xcf   : > { %1011 = vmatpush1.bf16.msra.mxu0 %v1010_v45 }
  0xd0   : > { %1139 = vmatpush1.bf16.msra.mxu1 %v1138_v46  ;;  %1013 = vmatprep.subr.bf16.mxu0 %v1012_v47 }
  0xd1   : > { %1141 = vmatprep.subr.bf16.mxu1 %v1140_v51 }
  0xd3   : > { %1015 = vmatpush1.bf16.msra.mxu0 %v1014_v56 }
  0xd4   : > { %1143 = vmatpush1.bf16.msra.mxu1 %v1142_v57  ;;  %1017 = vmatprep.subr.bf16.mxu0 %v1016_v58 }
  0xd5   : > { %1145 = vmatprep.subr.bf16.mxu1 %v1144_v62 }
  0xd7   : > { %1019 = vmatpush1.bf16.msra.mxu0 %v1018_v4 }
  0xd8   : > { %1147 = vmatpush1.bf16.msra.mxu1 %v1146_v5  ;;  %1021 = vmatprep.subr.bf16.mxu0 %v1020_v6 }
  0xd9   : > { %1149 = vmatprep.subr.bf16.mxu1 %v1148_v9 }
  0xdb   : > { %1023 = vmatpush1.bf16.msra.mxu0 %v1022_v13 }
  0xdc   : > { %1151 = vmatpush1.bf16.msra.mxu1 %v1150_v14 }
  0xde   : > { %608 = vmatmul.mubr.f32.vlgmr.msra.gmra.mrb[0].mxu0 %v1583_v22 }
  0xdf   : > { %750 = vmatmul.mubr.f32.vlgmr.msra.gmra.mrb[0].mxu1 %v1583_v22 }
 0x1b1   : > { %v609_v15 = vpop.f32.mrb[0].mxu0 }
 0x1b2   : > { %756 = vst [vmem:[%s192_s17] sm:$0x3] %v609_v15  ;;  %v751_v16 = vpop.f32.mrb[0].mxu1  ;;  %v611_v17 = vpop.f32.mrb[1].mxu0 }
 0x1b3   : > { %887 = vst [vmem:[%s192_s17 + $0x4] sm:$0x3] %v751_v16  ;;  %886 = vst [vmem:[%s192_s17 + $0x2] sm:$0x3] %v611_v17  ;;  %v753_v22 = vpop.f32.mrb[1].mxu1 }
 0x1b4   : > { %888 = vst [vmem:[%s192_s17 + $0x6] sm:$0x3] %v753_v22 }
 0x1b5   : > { %1306 = shalt.err (!%p1303_p5)
}
 0x1b6   : > { %s1307_s23 = scalar_lea.hbm %s1599_s6, 128  ;;  %s1311_s3 = scalar_lea.hbm %s1650_s2, 256 }
 0x1b7   : > { %p1308_p9 = scmp.ne.s32.totalorder %s1599_s6, %s1307_s23  ;;  %p1312_p7 = scmp.lt.u32.totalorder %s1599_s6, %s1650_s2 }
 0x1b8   : > { %p1313_p3 = scmp.lt.u32.totalorder %s1311_s3, %s1307_s23  ;;  %p1315_p4 = scmp.lt.u32.totalorder %s1307_s23, %s1599_s6 }
 0x1b9   : > { %p1309_p1 = pnand %p1308_p9, %p1500_p10 }
 0x1ba   : > { %p1314_p13 = por %p1313_p3, %p1312_p7 }
 0x1bb   : > { %p1310_p2 = pneg %p1309_p1 }
 0x1bc   : > { %p1316_p6 = por %p1315_p4, %p1314_p13 }
 0x1be   : > { %p1317_p8 = pnand %p1316_p6, %p1310_p2 }
 0x1c0   : > { %1320 = shalt.err (!%p1317_p8)
}
 0x1c1   : > { %s1387_s16 = smov 32   ;;  %s1388_s17 = smov 2  }
 0x1c2   : > { %1162 = dma.vmem_to_hbm [thread:$0]  (%p1500_p10), %s1594_s19, 128, %s1599_s6, %s764_s7, %s1387_s16, %s1387_s16, %s1388_s17  }
 0x1c3 PF: > { %s793_s21 = sand.u32 1, %s1359_s9   ;;  %p1668_p12 = scmp.ne.s32.totalorder %s1658_s20, 0 }
 0x1c4   : > { %p1669_p11 = scmp.ge.s32.totalorder %s1379_s14, 2  ;;  %s794_s4 = scalar_lea.sflag [#allocation4], %s793_s21 }
 0x1c6   : > { %p1173_p0 = pnand %p1669_p11, %p1668_p12 }
 0x1c8   : > { %1354 = dma.done.wait (!%p1173_p0), %s794_s4, 128  }
 0x1c9   : > { %1356 = vsyncadd (!%p1173_p0), %s794_s4, 4294967168  ;;  %s19_s14 = sadd.s32 1, %s1379_s14   ;;  %s1670_s9 = smov %s1363_s10 }
 0x1ca   : > { %p16_p5 = scmp.ge.s32.totalorder %s19_s14, 4   ;;  %s1671_s10 = smov %s1367_s11 }
 0x1cb   : > { %s1672_s11 = smov %s1509_s28  ;;  %s1673_s12 = smov %s1375_s13 }
 0x1cc   : > { %s1674_s13 = smov %s1676_s25  ;;  %18 = sbr.rel (!%p16_p5) target bundleno = 7 (0x7), region = 80 }
 0x1d3   :  { %799 = vsyncpa [#allocation3], 1 }
 0x1d4   :  { %801 = vsyncpa [#allocation3 + $0x1], 1 }
 0x1d5   :  { %802 = vsyncpa [#allocation6], 1 }
 0x1d6   :  { %803 = vsyncpa [#allocation4], 1 }
 0x1d7   :  { %805 = vsyncpa [#allocation4 + $0x1], 1 }

</bundles_post_ra>
